<compile_context>
chip_gen: v7x
topology: tpu7x:2x2x1
jax: 0.10.0
libtpu: 0.0.40
codegen_flags: <defaults>
</compile_context>

<pallas_src>
import functools

import jax
import jax.numpy as jnp
import numpy as np
from jax import lax
from jax.experimental import pallas as pl
from jax.experimental.pallas import tpu as pltpu


# --------------------------------------------------------------------------
# Pallas kernel: ScConv forward for B_TILE batch samples (one grid step).
# Layout: rows are sample-major channels (row = b*C + c), lanes are H*W.
# --------------------------------------------------------------------------
def scconv_kernel(x_ref, pmat_ref, params_ref, wsq1_ref, wsq2_ref, wgwc_ref,
                  wy2_ref, masks_ref, o_ref, *, B_TILE, C, W, up_sq, gks,
                  gate_threshold, gn_eps):
    x = x_ref[...]                                    # (BC, HW) f32
    pmat = pmat_ref[...]                              # (BC, BC) group-average matrix
    params = params_ref[...]                          # (BC, 4) packed per-channel params
    gnw = params[:, 0:1]
    gnb = params[:, 1:2]
    bgwc = params[:, 2:3]
    wgamma = params[:, 3:4]                           # gn_w / sum(gn_w) (precomputed)
    r = gks // 2

    # ---------------- SRU: GroupNorm + sigmoid gate ------------------------
    mean_c = jnp.mean(x, axis=1, keepdims=True)       # per-channel means (BC, 1)
    gmean = jnp.dot(pmat, mean_c, preferred_element_type=jnp.float32)
    xc = x - gmean                                    # centered
    var_c = jnp.mean(xc * xc, axis=1, keepdims=True)
    gvar = jnp.dot(pmat, var_c, preferred_element_type=jnp.float32)

    gn_x = xc * lax.rsqrt(gvar + gn_eps) * gnw + gnb
    rew = jax.nn.sigmoid(gn_x * wgamma)
    w1 = jnp.where(rew > gate_threshold, 1.0, rew)
    w2 = jnp.where(rew > gate_threshold, 0.0, rew)
    x1 = w1 * x
    x2 = w2 * x

    # ---------------- CRU squeeze (reconstruct folded into the weights) ----
    # sq = Wsq @ (x1 + swap_halves(x2)) == Wsq@x1 + (Wsq@S)@x2
    sq = (jnp.dot(wsq1_ref[...], x1, preferred_element_type=jnp.float32)
          + jnp.dot(wsq2_ref[...], x2, preferred_element_type=jnp.float32))
    n_up = B_TILE * up_sq
    up_s = sq[:n_up]                                  # (B*up_sq, HW)
    low_s = sq[n_up:]                                 # (B*low_sq, HW)

    # GWC (grouped 3x3, pad=1) + PWC1, as ONE matmul over 9 shifted/masked taps.
    # Lane rolls stay inside each row (one sample's spatial map), so masks are
    # shared across samples/channels.
    masks = masks_ref[...]                            # (gks*gks, HW) {0,1}
    taps = []
    k = 0
    for dy in range(-r, r + 1):
        for dx in range(-r, r + 1):
            shift = dy * W + dx
            t = up_s if shift == 0 else jnp.roll(up_s, -shift, axis=1)
            taps.append(t * masks[k:k + 1, :])
            k += 1
    gwc_in = jnp.concatenate(taps, axis=0)            # (9*B*up_sq, HW)
    y1 = jnp.dot(wgwc_ref[...], gwc_in,
                 preferred_element_type=jnp.float32) + bgwc      # (BC, HW)
    # Y2 = [PWC2(low_s); low_s] via a single stacked block-diag matmul.
    y2 = jnp.dot(wy2_ref[...], low_s,
                 preferred_element_type=jnp.float32)             # (BC, HW)

    # ---------------- pooled softmax gate + channel fold (no 2C concat) ----
    p1 = jnp.mean(y1, axis=1, keepdims=True)          # (BC, 1)
    p2 = jnp.mean(y2, axis=1, keepdims=True)          # (BC, 1)
    pooled = jnp.concatenate([p1, p2], axis=1)        # (BC, 2)
    sm_blocks = []
    for b in range(B_TILE):                           # unrolled, tiny (C,2) blocks
        pb = pooled[b * C:(b + 1) * C, :]
        m = jnp.max(jnp.max(pb, axis=1, keepdims=True), axis=0, keepdims=True)
        e = jnp.exp(pb - m)
        s = jnp.sum(jnp.sum(e, axis=1, keepdims=True), axis=0, keepdims=True)
        sm_blocks.append(e / s)
    sm = sm_blocks[0] if B_TILE == 1 else jnp.concatenate(sm_blocks, axis=0)
    o_ref[...] = sm[:, 0:1] * y1 + sm[:, 1:2] * y2


# --------------------------------------------------------------------------
# Wrapper: host-side weight packing + pallas_call (no activation transposes).
# --------------------------------------------------------------------------
def scconv_forward(x, gn_w, gn_b, w_sq1, w_sq2, w_gwc, b_gwc, w_pwc1, w_pwc2,
                   *, group_num=4, gate_threshold=0.5, gn_eps=1e-5,
                   alpha=0.5, squeeze_radio=2, group_size=2, gks=3,
                   max_batch_tile=8):
    N, C, H, W = x.shape
    HW = H * W
    up_ch = int(alpha * C)
    low_ch = C - up_ch
    up_sq = up_ch // squeeze_radio
    low_sq = low_ch // squeeze_radio
    sq_tot = up_sq + low_sq
    half = C // 2
    r = gks // 2
    out_per_g = C // group_size
    in_per_g = up_sq // group_size
    cg = C // group_num

    # Batch tile: largest divisor of N keeping the sublane block 8-aligned.
    cand = [b for b in range(min(N, max_batch_tile), 0, -1)
            if N % b == 0 and (b * C) % 8 == 0]
    B_TILE = cand[0] if cand else N         # full-extent block is always legal
    BC = B_TILE * C
    n_up = B_TILE * up_sq

    # ---- host-side packed parameters (precompute once in practice) --------
    gn_w_np = np.asarray(gn_w, np.float32).reshape(C)
    gn_b_np = np.asarray(gn_b, np.float32).reshape(C)
    b_gwc_np = np.asarray(b_gwc, np.float32).reshape(C)
    per_ch = np.stack(
        [gn_w_np, gn_b_np, b_gwc_np, gn_w_np / gn_w_np.sum()], axis=1)  # (C,4)
    params = np.tile(per_ch, (B_TILE, 1))                               # (BC,4)

    # Contiguous-group averaging matrix; sample boundaries coincide with
    # group boundaries, so it's one block-diagonal over the whole BC range.
    pmat = np.zeros((BC, BC), np.float32)
    for g in range(BC // cg):
        pmat[g * cg:(g + 1) * cg, g * cg:(g + 1) * cg] = 1.0 / cg

    # Block-diag squeeze1/2 over samples; rows reordered so all up_s rows
    # come first (contiguous sublane slices in-kernel).
    wsq1_np = np.asarray(w_sq1, np.float32)                 # (up_sq, up_ch)
    wsq2_np = np.asarray(w_sq2, np.float32)                 # (low_sq, low_ch)
    wsq1_big = np.zeros((B_TILE * sq_tot, BC), np.float32)
    for b in range(B_TILE):
        wsq1_big[b * up_sq:(b + 1) * up_sq, b * C:b * C + up_ch] = wsq1_np
        lo = n_up + b * low_sq
        wsq1_big[lo:lo + low_sq, b * C + up_ch:(b + 1) * C] = wsq2_np
    # SRU reconstruct (channel-half swap) folded in: wsq2_big = wsq1_big @ S.
    S = np.zeros((C, C), np.float32)
    for c in range(C):
        S[c, (c + half) % C] = 1.0
    S_big = np.kron(np.eye(B_TILE, dtype=np.float32), S)
    wsq2_big = wsq1_big @ S_big

    # Grouped-conv weights stacked per tap, block-diag over samples; PWC1 is
    # folded into the center tap (its mask is all-ones -> unshifted up_s).
    w_gwc_np = np.asarray(w_gwc, np.float32)                # (C, up_sq/groups, 3, 3)
    w_pwc1_np = np.asarray(w_pwc1, np.float32)              # (C, up_sq)
    wgwc_big = np.zeros((BC, gks * gks * n_up), np.float32)
    kc = r * gks + r
    for b in range(B_TILE):
        for o in range(C):
            g = o // out_per_g
            row = b * C + o
            for ci in range(in_per_g):
                cin = g * in_per_g + ci
                for ky in range(gks):
                    for kx in range(gks):
                        k = ky * gks + kx
                        wgwc_big[row, k * n_up + b * up_sq + cin] = \
                            w_gwc_np[o, ci, ky, kx]
            for cin in range(up_sq):
                wgwc_big[row, kc * n_up + b * up_sq + cin] += w_pwc1_np[o, cin]

    # Y2 = [PWC2(low_s); low_s] as one stacked weight, block-diag over samples.
    wy2_s = np.concatenate([np.asarray(w_pwc2, np.float32),
                            np.eye(low_sq, dtype=np.float32)], axis=0)  # (C, low_sq)
    wy2_big = np.kron(np.eye(B_TILE, dtype=np.float32), wy2_s)          # (BC, B*low_sq)

    # Per-tap spatial validity masks (conv zero-padding), shared by all rows.
    hh = np.repeat(np.arange(H), W)
    ww = np.tile(np.arange(W), H)
    masks = np.zeros((gks * gks, HW), np.float32)
    k = 0
    for dy in range(-r, r + 1):
        for dx in range(-r, r + 1):
            masks[k] = ((hh + dy >= 0) & (hh + dy < H) &
                        (ww + dx >= 0) & (ww + dx < W)).astype(np.float32)
            k += 1

    # ---- activations: FREE reshape to (N*C, HW); no transpose, no copy -----
    x2d = x.astype(jnp.float32).reshape(N * C, HW)

    kernel = functools.partial(
        scconv_kernel, B_TILE=B_TILE, C=C, W=W, up_sq=up_sq, gks=gks,
        gate_threshold=gate_threshold, gn_eps=gn_eps)

    def const(arr):
        return pl.BlockSpec(arr.shape, lambda i: (0, 0))

    out2d = pl.pallas_call(
        kernel,
        out_shape=jax.ShapeDtypeStruct((N * C, HW), jnp.float32),
        grid_spec=pltpu.PrefetchScalarGridSpec(
            num_scalar_prefetch=0,
            grid=(N // B_TILE,),
            in_specs=[
                pl.BlockSpec((BC, HW), lambda i: (i, 0)),   # x (lane-dense)
                const(pmat),
                const(params),
                const(wsq1_big),
                const(wsq2_big),
                const(wgwc_big),
                const(wy2_big),
                const(masks),
            ],
            out_specs=pl.BlockSpec((BC, HW), lambda i: (i, 0)),
        ),
        compiler_params=pltpu.CompilerParams(
            dimension_semantics=("parallel",)),
    )(x2d, jnp.asarray(pmat), jnp.asarray(params), jnp.asarray(wsq1_big),
      jnp.asarray(wsq2_big), jnp.asarray(wgwc_big), jnp.asarray(wy2_big),
      jnp.asarray(masks))

    return out2d.reshape(N, C, H, W)


# --------------------------------------------------------------------------
# Pure-JAX reference (mirrors the PyTorch module)
# --------------------------------------------------------------------------
def scconv_ref(x, gn_w, gn_b, w_sq1, w_sq2, w_gwc, b_gwc, w_pwc1, w_pwc2,
               *, group_num, gate, eps, group_size, up_ch):
    N, C, H, W = x.shape
    xg = x.reshape(N, group_num, -1)
    mean = xg.mean(axis=2, keepdims=True)
    var = xg.var(axis=2, keepdims=True)
    gn = ((xg - mean) / jnp.sqrt(var + eps)).reshape(N, C, H, W)
    gn = gn * gn_w.reshape(1, C, 1, 1) + gn_b.reshape(1, C, 1, 1)
    w_gamma = (gn_w / jnp.sum(gn_w)).reshape(1, C, 1, 1)
    rew = jax.nn.sigmoid(gn * w_gamma)
    w1 = jnp.where(rew > gate, jnp.ones_like(rew), rew)
    w2 = jnp.where(rew > gate, jnp.zeros_like(rew), rew)
    x1, x2 = w1 * x, w2 * x
    h = C // 2
    xs = jnp.concatenate([x1[:, :h] + x2[:, h:], x1[:, h:] + x2[:, :h]], axis=1)

    up, low = xs[:, :up_ch], xs[:, up_ch:]

    def conv1x1(inp, w):
        return jnp.einsum('nchw,oc->nohw', inp, w)

    up_s = conv1x1(up, w_sq1)
    low_s = conv1x1(low, w_sq2)
    gwc = lax.conv_general_dilated(
        up_s, w_gwc, window_strides=(1, 1), padding='SAME',
        dimension_numbers=('NCHW', 'OIHW', 'NCHW'),
        feature_group_count=group_size) + b_gwc.reshape(1, C, 1, 1)
    y1 = gwc + conv1x1(up_s, w_pwc1)
    y2 = jnp.concatenate([conv1x1(low_s, w_pwc2), low_s], axis=1)
    out = jnp.concatenate([y1, y2], axis=1)
    pooled = out.mean(axis=(2, 3), keepdims=True)
    sm = jax.nn.softmax(pooled, axis=1)
    out = sm * out
    return out[:, :C] + out[:, C:]


# --------------------------------------------------------------------------
if __name__ == "__main__":
    # ScConv(op_channel=8, group_num=4) on a (2, 8, 16, 16) input.
    N, C, H, W = 2, 8, 16, 16
    group_num = 4
    gate_threshold = 0.5
    gn_eps = 1e-5
    alpha = 0.5
    squeeze_radio = 2
    group_size = 2
    gks = 3

    up_ch = int(alpha * C)            # 4
    low_ch = C - up_ch                # 4
    up_sq = up_ch // squeeze_radio    # 2
    low_sq = low_ch // squeeze_radio  # 2

    key = jax.random.PRNGKey(0)
    ks = jax.random.split(key, 10)
    x = jax.random.normal(ks[0], (N, C, H, W), jnp.float32)

    # Deterministic synthetic parameters (shapes from the module __init__).
    gn_w = jax.random.uniform(ks[1], (C,), jnp.float32, 0.5, 1.5)   # GroupNorm weight
    gn_b = 0.1 * jax.random.normal(ks[2], (C,), jnp.float32)        # GroupNorm bias
    w_sq1 = 0.3 * jax.random.normal(ks[3], (up_sq, up_ch), jnp.float32)
    w_sq2 = 0.3 * jax.random.normal(ks[4], (low_sq, low_ch), jnp.float32)
    w_gwc = 0.2 * jax.random.normal(ks[5], (C, up_sq // group_size, gks, gks),
                                    jnp.float32)                     # grouped 3x3
    b_gwc = 0.1 * jax.random.normal(ks[6], (C,), jnp.float32)
    w_pwc1 = 0.3 * jax.random.normal(ks[7], (C, up_sq), jnp.float32)
    w_pwc2 = 0.3 * jax.random.normal(ks[8], (C - low_sq, low_sq), jnp.float32)

    y = scconv_forward(x, gn_w, gn_b, w_sq1, w_sq2, w_gwc, b_gwc, w_pwc1, w_pwc2,
                       group_num=group_num, gate_threshold=gate_threshold,
                       gn_eps=gn_eps, alpha=alpha, squeeze_radio=squeeze_radio,
                       group_size=group_size, gks=gks)
    jax.block_until_ready(y)

    y_ref = scconv_ref(x, gn_w, gn_b, w_sq1, w_sq2, w_gwc, b_gwc, w_pwc1, w_pwc2,
                       group_num=group_num, gate=gate_threshold, eps=gn_eps,
                       group_size=group_size, up_ch=up_ch)
    np.testing.assert_allclose(np.asarray(y), np.asarray(y_ref),
                               rtol=1e-3, atol=1e-3)
    print("KERNEL_OK")
</pallas_src>

<mosaic_0001>
module attributes {stable_mosaic.version = 11 : i64} {
  func.func @scconv_kernel(%arg0: i32, %arg1: memref<16x256xf32, #tpu.memory_space<vmem>>, %arg2: memref<16x16xf32, #tpu.memory_space<vmem>>, %arg3: memref<16x4xf32, #tpu.memory_space<vmem>>, %arg4: memref<8x16xf32, #tpu.memory_space<vmem>>, %arg5: memref<8x16xf32, #tpu.memory_space<vmem>>, %arg6: memref<16x36xf32, #tpu.memory_space<vmem>>, %arg7: memref<16x4xf32, #tpu.memory_space<vmem>>, %arg8: memref<9x256xf32, #tpu.memory_space<vmem>>, %arg9: memref<16x256xf32, #tpu.memory_space<vmem>>) attributes {dimension_semantics = [#tpu.dimension_semantics<parallel>], iteration_bounds = array<i64: 1>, scalar_prefetch = 0 : i64, scratch_operands = 0 : i64, tpu.core_type = #tpu.core_type<tc>, window_params = [{transform_indices = @transform_0, window_bounds = array<i64: 16, 256>}, {pipeline_mode = #tpu.pipeline_mode<synchronous>, transform_indices = @transform_1, window_bounds = array<i64: 16, 16>}, {pipeline_mode = #tpu.pipeline_mode<synchronous>, transform_indices = @transform_2, window_bounds = array<i64: 16, 4>}, {pipeline_mode = #tpu.pipeline_mode<synchronous>, transform_indices = @transform_3, window_bounds = array<i64: 8, 16>}, {pipeline_mode = #tpu.pipeline_mode<synchronous>, transform_indices = @transform_4, window_bounds = array<i64: 8, 16>}, {pipeline_mode = #tpu.pipeline_mode<synchronous>, transform_indices = @transform_5, window_bounds = array<i64: 16, 36>}, {pipeline_mode = #tpu.pipeline_mode<synchronous>, transform_indices = @transform_6, window_bounds = array<i64: 16, 4>}, {pipeline_mode = #tpu.pipeline_mode<synchronous>, transform_indices = @transform_7, window_bounds = array<i64: 9, 256>}, {transform_indices = @transform_8, window_bounds = array<i64: 16, 256>}]} {
    %c0 = arith.constant 0 : index
    %c0_0 = arith.constant 0 : index
    %0 = vector.load %arg1[%c0, %c0_0] : memref<16x256xf32, #tpu.memory_space<vmem>>, vector<16x256xf32>
    %c0_1 = arith.constant 0 : index
    %c0_2 = arith.constant 0 : index
    %1 = vector.load %arg2[%c0_1, %c0_2] : memref<16x16xf32, #tpu.memory_space<vmem>>, vector<16x16xf32>
    %c0_3 = arith.constant 0 : index
    %c0_4 = arith.constant 0 : index
    %2 = vector.load %arg3[%c0_3, %c0_4] : memref<16x4xf32, #tpu.memory_space<vmem>>, vector<16x4xf32>
    %3 = vector.extract_strided_slice %2 {offsets = [0, 0], sizes = [16, 1], strides = [1, 1]} : vector<16x4xf32> to vector<16x1xf32>
    %4 = vector.extract_strided_slice %2 {offsets = [0, 1], sizes = [16, 1], strides = [1, 1]} : vector<16x4xf32> to vector<16x1xf32>
    %5 = vector.extract_strided_slice %2 {offsets = [0, 2], sizes = [16, 1], strides = [1, 1]} : vector<16x4xf32> to vector<16x1xf32>
    %6 = vector.extract_strided_slice %2 {offsets = [0, 3], sizes = [16, 1], strides = [1, 1]} : vector<16x4xf32> to vector<16x1xf32>
    %cst = arith.constant dense<0.000000e+00> : vector<16xf32>
    %7 = vector.multi_reduction <add>, %0, %cst [1] : vector<16x256xf32> to vector<16xf32>
    %8 = vector.shape_cast %7 : vector<16xf32> to vector<16x1xf32>
    %cst_5 = arith.constant 2.560000e+02 : f32
    %9 = vector.broadcast %cst_5 : f32 to vector<16x1xf32>
    %10 = arith.divf %8, %9 : vector<16x1xf32>
    %cst_6 = arith.constant dense<0.000000e+00> : vector<16x1xf32>
    %11 = tpu.matmul %1, %10, %cst_6 {dimension_numbers = #tpu.dot_dimension_numbers<[1], [0], [0], [1], [0, 0, 1, 1], [], []>} : vector<16x16xf32>, vector<16x1xf32>, vector<16x1xf32> -> vector<16x1xf32>
    %12 = vector.broadcast %11 : vector<16x1xf32> to vector<16x256xf32>
    %13 = arith.subf %0, %12 : vector<16x256xf32>
    %14 = arith.mulf %13, %13 : vector<16x256xf32>
    %cst_7 = arith.constant dense<0.000000e+00> : vector<16xf32>
    %15 = vector.multi_reduction <add>, %14, %cst_7 [1] : vector<16x256xf32> to vector<16xf32>
    %16 = vector.shape_cast %15 : vector<16xf32> to vector<16x1xf32>
    %cst_8 = arith.constant 2.560000e+02 : f32
    %17 = vector.broadcast %cst_8 : f32 to vector<16x1xf32>
    %18 = arith.divf %16, %17 : vector<16x1xf32>
    %cst_9 = arith.constant dense<0.000000e+00> : vector<16x1xf32>
    %19 = tpu.matmul %1, %18, %cst_9 {dimension_numbers = #tpu.dot_dimension_numbers<[1], [0], [0], [1], [0, 0, 1, 1], [], []>} : vector<16x16xf32>, vector<16x1xf32>, vector<16x1xf32> -> vector<16x1xf32>
    %cst_10 = arith.constant 9.99999974E-6 : f32
    %20 = vector.broadcast %cst_10 : f32 to vector<16x1xf32>
    %21 = arith.addf %19, %20 : vector<16x1xf32>
    %22 = math.rsqrt %21 : vector<16x1xf32>
    %23 = vector.broadcast %22 : vector<16x1xf32> to vector<16x256xf32>
    %24 = arith.mulf %13, %23 : vector<16x256xf32>
    %25 = vector.broadcast %3 : vector<16x1xf32> to vector<16x256xf32>
    %26 = arith.mulf %24, %25 : vector<16x256xf32>
    %27 = vector.broadcast %4 : vector<16x1xf32> to vector<16x256xf32>
    %28 = arith.addf %26, %27 : vector<16x256xf32>
    %29 = vector.broadcast %6 : vector<16x1xf32> to vector<16x256xf32>
    %30 = arith.mulf %28, %29 : vector<16x256xf32>
    %31 = arith.negf %30 : vector<16x256xf32>
    %32 = math.exp %31 : vector<16x256xf32>
    %cst_11 = arith.constant 1.000000e+00 : f32
    %33 = vector.broadcast %cst_11 : f32 to vector<16x256xf32>
    %34 = arith.addf %33, %32 : vector<16x256xf32>
    %35 = arith.divf %33, %34 : vector<16x256xf32>
    %cst_12 = arith.constant 5.000000e-01 : f32
    %36 = vector.broadcast %cst_12 : f32 to vector<16x256xf32>
    %37 = arith.cmpf ogt, %35, %36 : vector<16x256xf32>
    %cst_13 = arith.constant 1.000000e+00 : f32
    %38 = vector.broadcast %cst_13 : f32 to vector<16x256xf32>
    %39 = arith.select %37, %38, %35 : vector<16x256xi1>, vector<16x256xf32>
    %cst_14 = arith.constant 5.000000e-01 : f32
    %40 = vector.broadcast %cst_14 : f32 to vector<16x256xf32>
    %41 = arith.cmpf ogt, %35, %40 : vector<16x256xf32>
    %cst_15 = arith.constant 0.000000e+00 : f32
    %42 = vector.broadcast %cst_15 : f32 to vector<16x256xf32>
    %43 = arith.select %41, %42, %35 : vector<16x256xi1>, vector<16x256xf32>
    %44 = arith.mulf %39, %0 : vector<16x256xf32>
    %45 = arith.mulf %43, %0 : vector<16x256xf32>
    %c0_16 = arith.constant 0 : index
    %c0_17 = arith.constant 0 : index
    %46 = vector.load %arg4[%c0_16, %c0_17] : memref<8x16xf32, #tpu.memory_space<vmem>>, vector<8x16xf32>
    %cst_18 = arith.constant dense<0.000000e+00> : vector<8x256xf32>
    %47 = tpu.matmul %46, %44, %cst_18 {dimension_numbers = #tpu.dot_dimension_numbers<[1], [0], [0], [1], [0, 0, 1, 1], [], []>} : vector<8x16xf32>, vector<16x256xf32>, vector<8x256xf32> -> vector<8x256xf32>
    %c0_19 = arith.constant 0 : index
    %c0_20 = arith.constant 0 : index
    %48 = vector.load %arg5[%c0_19, %c0_20] : memref<8x16xf32, #tpu.memory_space<vmem>>, vector<8x16xf32>
    %cst_21 = arith.constant dense<0.000000e+00> : vector<8x256xf32>
    %49 = tpu.matmul %48, %45, %cst_21 {dimension_numbers = #tpu.dot_dimension_numbers<[1], [0], [0], [1], [0, 0, 1, 1], [], []>} : vector<8x16xf32>, vector<16x256xf32>, vector<8x256xf32> -> vector<8x256xf32>
    %50 = arith.addf %47, %49 : vector<8x256xf32>
    %51 = vector.extract_strided_slice %50 {offsets = [0, 0], sizes = [4, 256], strides = [1, 1]} : vector<8x256xf32> to vector<4x256xf32>
    %52 = vector.extract_strided_slice %50 {offsets = [4, 0], sizes = [4, 256], strides = [1, 1]} : vector<8x256xf32> to vector<4x256xf32>
    %c0_22 = arith.constant 0 : index
    %c0_23 = arith.constant 0 : index
    %53 = vector.load %arg8[%c0_22, %c0_23] : memref<9x256xf32, #tpu.memory_space<vmem>>, vector<9x256xf32>
    %54 = vector.extract_strided_slice %51 {offsets = [0, 239], sizes = [4, 17], strides = [1, 1]} : vector<4x256xf32> to vector<4x17xf32>
    %55 = vector.extract_strided_slice %51 {offsets = [0, 0], sizes = [4, 239], strides = [1, 1]} : vector<4x256xf32> to vector<4x239xf32>
    %56 = tpu.concatenate %54, %55 in 1 : vector<4x17xf32>, vector<4x239xf32> -> vector<4x256xf32>
    %57 = vector.extract_strided_slice %53 {offsets = [0, 0], sizes = [1, 256], strides = [1, 1]} : vector<9x256xf32> to vector<1x256xf32>
    %58 = vector.broadcast %57 : vector<1x256xf32> to vector<4x256xf32>
    %59 = arith.mulf %56, %58 : vector<4x256xf32>
    %60 = vector.extract_strided_slice %51 {offsets = [0, 240], sizes = [4, 16], strides = [1, 1]} : vector<4x256xf32> to vector<4x16xf32>
    %61 = vector.extract_strided_slice %51 {offsets = [0, 0], sizes = [4, 240], strides = [1, 1]} : vector<4x256xf32> to vector<4x240xf32>
    %62 = tpu.concatenate %60, %61 in 1 : vector<4x16xf32>, vector<4x240xf32> -> vector<4x256xf32>
    %63 = vector.extract_strided_slice %53 {offsets = [1, 0], sizes = [1, 256], strides = [1, 1]} : vector<9x256xf32> to vector<1x256xf32>
    %64 = vector.broadcast %63 : vector<1x256xf32> to vector<4x256xf32>
    %65 = arith.mulf %62, %64 : vector<4x256xf32>
    %66 = vector.extract_strided_slice %51 {offsets = [0, 241], sizes = [4, 15], strides = [1, 1]} : vector<4x256xf32> to vector<4x15xf32>
    %67 = vector.extract_strided_slice %51 {offsets = [0, 0], sizes = [4, 241], strides = [1, 1]} : vector<4x256xf32> to vector<4x241xf32>
    %68 = tpu.concatenate %66, %67 in 1 : vector<4x15xf32>, vector<4x241xf32> -> vector<4x256xf32>
    %69 = vector.extract_strided_slice %53 {offsets = [2, 0], sizes = [1, 256], strides = [1, 1]} : vector<9x256xf32> to vector<1x256xf32>
    %70 = vector.broadcast %69 : vector<1x256xf32> to vector<4x256xf32>
    %71 = arith.mulf %68, %70 : vector<4x256xf32>
    %72 = vector.extract_strided_slice %51 {offsets = [0, 255], sizes = [4, 1], strides = [1, 1]} : vector<4x256xf32> to vector<4x1xf32>
    %73 = vector.extract_strided_slice %51 {offsets = [0, 0], sizes = [4, 255], strides = [1, 1]} : vector<4x256xf32> to vector<4x255xf32>
    %74 = tpu.concatenate %72, %73 in 1 : vector<4x1xf32>, vector<4x255xf32> -> vector<4x256xf32>
    %75 = vector.extract_strided_slice %53 {offsets = [3, 0], sizes = [1, 256], strides = [1, 1]} : vector<9x256xf32> to vector<1x256xf32>
    %76 = vector.broadcast %75 : vector<1x256xf32> to vector<4x256xf32>
    %77 = arith.mulf %74, %76 : vector<4x256xf32>
    %78 = vector.extract_strided_slice %53 {offsets = [4, 0], sizes = [1, 256], strides = [1, 1]} : vector<9x256xf32> to vector<1x256xf32>
    %79 = vector.broadcast %78 : vector<1x256xf32> to vector<4x256xf32>
    %80 = arith.mulf %51, %79 : vector<4x256xf32>
    %81 = vector.extract_strided_slice %51 {offsets = [0, 1], sizes = [4, 255], strides = [1, 1]} : vector<4x256xf32> to vector<4x255xf32>
    %82 = vector.extract_strided_slice %51 {offsets = [0, 0], sizes = [4, 1], strides = [1, 1]} : vector<4x256xf32> to vector<4x1xf32>
    %83 = tpu.concatenate %81, %82 in 1 : vector<4x255xf32>, vector<4x1xf32> -> vector<4x256xf32>
    %84 = vector.extract_strided_slice %53 {offsets = [5, 0], sizes = [1, 256], strides = [1, 1]} : vector<9x256xf32> to vector<1x256xf32>
    %85 = vector.broadcast %84 : vector<1x256xf32> to vector<4x256xf32>
    %86 = arith.mulf %83, %85 : vector<4x256xf32>
    %87 = vector.extract_strided_slice %51 {offsets = [0, 15], sizes = [4, 241], strides = [1, 1]} : vector<4x256xf32> to vector<4x241xf32>
    %88 = vector.extract_strided_slice %51 {offsets = [0, 0], sizes = [4, 15], strides = [1, 1]} : vector<4x256xf32> to vector<4x15xf32>
    %89 = tpu.concatenate %87, %88 in 1 : vector<4x241xf32>, vector<4x15xf32> -> vector<4x256xf32>
    %90 = vector.extract_strided_slice %53 {offsets = [6, 0], sizes = [1, 256], strides = [1, 1]} : vector<9x256xf32> to vector<1x256xf32>
    %91 = vector.broadcast %90 : vector<1x256xf32> to vector<4x256xf32>
    %92 = arith.mulf %89, %91 : vector<4x256xf32>
    %93 = vector.extract_strided_slice %51 {offsets = [0, 16], sizes = [4, 240], strides = [1, 1]} : vector<4x256xf32> to vector<4x240xf32>
    %94 = vector.extract_strided_slice %51 {offsets = [0, 0], sizes = [4, 16], strides = [1, 1]} : vector<4x256xf32> to vector<4x16xf32>
    %95 = tpu.concatenate %93, %94 in 1 : vector<4x240xf32>, vector<4x16xf32> -> vector<4x256xf32>
    %96 = vector.extract_strided_slice %53 {offsets = [7, 0], sizes = [1, 256], strides = [1, 1]} : vector<9x256xf32> to vector<1x256xf32>
    %97 = vector.broadcast %96 : vector<1x256xf32> to vector<4x256xf32>
    %98 = arith.mulf %95, %97 : vector<4x256xf32>
    %99 = vector.extract_strided_slice %51 {offsets = [0, 17], sizes = [4, 239], strides = [1, 1]} : vector<4x256xf32> to vector<4x239xf32>
    %100 = vector.extract_strided_slice %51 {offsets = [0, 0], sizes = [4, 17], strides = [1, 1]} : vector<4x256xf32> to vector<4x17xf32>
    %101 = tpu.concatenate %99, %100 in 1 : vector<4x239xf32>, vector<4x17xf32> -> vector<4x256xf32>
    %102 = vector.extract_strided_slice %53 {offsets = [8, 0], sizes = [1, 256], strides = [1, 1]} : vector<9x256xf32> to vector<1x256xf32>
    %103 = vector.broadcast %102 : vector<1x256xf32> to vector<4x256xf32>
    %104 = arith.mulf %101, %103 : vector<4x256xf32>
    %105 = tpu.concatenate %59, %65, %71, %77, %80, %86, %92, %98, %104 in 0 : vector<4x256xf32>, vector<4x256xf32>, vector<4x256xf32>, vector<4x256xf32>, vector<4x256xf32>, vector<4x256xf32>, vector<4x256xf32>, vector<4x256xf32>, vector<4x256xf32> -> vector<36x256xf32>
    %c0_24 = arith.constant 0 : index
    %c0_25 = arith.constant 0 : index
    %106 = vector.load %arg6[%c0_24, %c0_25] : memref<16x36xf32, #tpu.memory_space<vmem>>, vector<16x36xf32>
    %cst_26 = arith.constant dense<0.000000e+00> : vector<16x256xf32>
    %107 = tpu.matmul %106, %105, %cst_26 {dimension_numbers = #tpu.dot_dimension_numbers<[1], [0], [0], [1], [0, 0, 1, 1], [], []>} : vector<16x36xf32>, vector<36x256xf32>, vector<16x256xf32> -> vector<16x256xf32>
    %108 = vector.broadcast %5 : vector<16x1xf32> to vector<16x256xf32>
    %109 = arith.addf %107, %108 : vector<16x256xf32>
    %c0_27 = arith.constant 0 : index
    %c0_28 = arith.constant 0 : index
    %110 = vector.load %arg7[%c0_27, %c0_28] : memref<16x4xf32, #tpu.memory_space<vmem>>, vector<16x4xf32>
    %cst_29 = arith.constant dense<0.000000e+00> : vector<16x256xf32>
    %111 = tpu.matmul %110, %52, %cst_29 {dimension_numbers = #tpu.dot_dimension_numbers<[1], [0], [0], [1], [0, 0, 1, 1], [], []>} : vector<16x4xf32>, vector<4x256xf32>, vector<16x256xf32> -> vector<16x256xf32>
    %cst_30 = arith.constant dense<0.000000e+00> : vector<16xf32>
    %112 = vector.multi_reduction <add>, %109, %cst_30 [1] : vector<16x256xf32> to vector<16xf32>
    %113 = vector.shape_cast %112 : vector<16xf32> to vector<16x1xf32>
    %cst_31 = arith.constant 2.560000e+02 : f32
    %114 = vector.broadcast %cst_31 : f32 to vector<16x1xf32>
    %115 = arith.divf %113, %114 : vector<16x1xf32>
    %cst_32 = arith.constant dense<0.000000e+00> : vector<16xf32>
    %116 = vector.multi_reduction <add>, %111, %cst_32 [1] : vector<16x256xf32> to vector<16xf32>
    %117 = vector.shape_cast %116 : vector<16xf32> to vector<16x1xf32>
    %cst_33 = arith.constant 2.560000e+02 : f32
    %118 = vector.broadcast %cst_33 : f32 to vector<16x1xf32>
    %119 = arith.divf %117, %118 : vector<16x1xf32>
    %120 = tpu.concatenate %115, %119 in 1 : vector<16x1xf32>, vector<16x1xf32> -> vector<16x2xf32>
    %121 = vector.extract_strided_slice %120 {offsets = [0, 0], sizes = [8, 2], strides = [1, 1]} : vector<16x2xf32> to vector<8x2xf32>
    %cst_34 = arith.constant dense<0xFF800000> : vector<8xf32>
    %122 = vector.multi_reduction <maximumf>, %121, %cst_34 [1] : vector<8x2xf32> to vector<8xf32>
    %123 = vector.shape_cast %122 : vector<8xf32> to vector<8x1xf32>
    %cst_35 = arith.constant dense<0xFF800000> : vector<1xf32>
    %124 = vector.multi_reduction <maximumf>, %123, %cst_35 [0] : vector<8x1xf32> to vector<1xf32>
    %125 = vector.shape_cast %124 : vector<1xf32> to vector<1x1xf32>
    %126 = vector.broadcast %125 : vector<1x1xf32> to vector<8x2xf32>
    %127 = arith.subf %121, %126 : vector<8x2xf32>
    %128 = math.exp %127 : vector<8x2xf32>
    %cst_36 = arith.constant dense<0.000000e+00> : vector<8xf32>
    %129 = vector.multi_reduction <add>, %128, %cst_36 [1] : vector<8x2xf32> to vector<8xf32>
    %130 = vector.shape_cast %129 : vector<8xf32> to vector<8x1xf32>
    %cst_37 = arith.constant dense<0.000000e+00> : vector<1xf32>
    %131 = vector.multi_reduction <add>, %130, %cst_37 [0] : vector<8x1xf32> to vector<1xf32>
    %132 = vector.shape_cast %131 : vector<1xf32> to vector<1x1xf32>
    %133 = vector.broadcast %132 : vector<1x1xf32> to vector<8x2xf32>
    %134 = arith.divf %128, %133 : vector<8x2xf32>
    %135 = vector.extract_strided_slice %120 {offsets = [8, 0], sizes = [8, 2], strides = [1, 1]} : vector<16x2xf32> to vector<8x2xf32>
    %cst_38 = arith.constant dense<0xFF800000> : vector<8xf32>
    %136 = vector.multi_reduction <maximumf>, %135, %cst_38 [1] : vector<8x2xf32> to vector<8xf32>
    %137 = vector.shape_cast %136 : vector<8xf32> to vector<8x1xf32>
    %cst_39 = arith.constant dense<0xFF800000> : vector<1xf32>
    %138 = vector.multi_reduction <maximumf>, %137, %cst_39 [0] : vector<8x1xf32> to vector<1xf32>
    %139 = vector.shape_cast %138 : vector<1xf32> to vector<1x1xf32>
    %140 = vector.broadcast %139 : vector<1x1xf32> to vector<8x2xf32>
    %141 = arith.subf %135, %140 : vector<8x2xf32>
    %142 = math.exp %141 : vector<8x2xf32>
    %cst_40 = arith.constant dense<0.000000e+00> : vector<8xf32>
    %143 = vector.multi_reduction <add>, %142, %cst_40 [1] : vector<8x2xf32> to vector<8xf32>
    %144 = vector.shape_cast %143 : vector<8xf32> to vector<8x1xf32>
    %cst_41 = arith.constant dense<0.000000e+00> : vector<1xf32>
    %145 = vector.multi_reduction <add>, %144, %cst_41 [0] : vector<8x1xf32> to vector<1xf32>
    %146 = vector.shape_cast %145 : vector<1xf32> to vector<1x1xf32>
    %147 = vector.broadcast %146 : vector<1x1xf32> to vector<8x2xf32>
    %148 = arith.divf %142, %147 : vector<8x2xf32>
    %149 = tpu.concatenate %134, %148 in 0 : vector<8x2xf32>, vector<8x2xf32> -> vector<16x2xf32>
    %150 = vector.extract_strided_slice %149 {offsets = [0, 0], sizes = [16, 1], strides = [1, 1]} : vector<16x2xf32> to vector<16x1xf32>
    %151 = vector.broadcast %150 : vector<16x1xf32> to vector<16x256xf32>
    %152 = arith.mulf %151, %109 : vector<16x256xf32>
    %153 = vector.extract_strided_slice %149 {offsets = [0, 1], sizes = [16, 1], strides = [1, 1]} : vector<16x2xf32> to vector<16x1xf32>
    %154 = vector.broadcast %153 : vector<16x1xf32> to vector<16x256xf32>
    %155 = arith.mulf %154, %111 : vector<16x256xf32>
    %156 = arith.addf %152, %155 : vector<16x256xf32>
    %c0_42 = arith.constant 0 : index
    %c0_43 = arith.constant 0 : index
    %157 = vector.load %arg9[%c0_42, %c0_43] : memref<16x256xf32, #tpu.memory_space<vmem>>, vector<16x256xf32>
    tpu.vector_store %arg9[%c0_42, %c0_43], %156 {strides = array<i32>} : memref<16x256xf32, #tpu.memory_space<vmem>>, vector<16x256xf32>,
    return
  }
  func.func @transform_0(%arg0: i32) -> (i32, i32) {
    %c0_i32 = arith.constant 0 : i32
    %c0_i32_0 = arith.constant 0 : i32
    return %arg0, %c0_i32 : i32, i32
  }
  func.func @transform_1(%arg0: i32) -> (i32, i32) {
    %c0_i32 = arith.constant 0 : i32
    %c0_i32_0 = arith.constant 0 : i32
    %c0_i32_1 = arith.constant 0 : i32
    return %c0_i32, %c0_i32_0 : i32, i32
  }
  func.func @transform_2(%arg0: i32) -> (i32, i32) {
    %c0_i32 = arith.constant 0 : i32
    %c0_i32_0 = arith.constant 0 : i32
    %c0_i32_1 = arith.constant 0 : i32
    return %c0_i32, %c0_i32_0 : i32, i32
  }
  func.func @transform_3(%arg0: i32) -> (i32, i32) {
    %c0_i32 = arith.constant 0 : i32
    %c0_i32_0 = arith.constant 0 : i32
    %c0_i32_1 = arith.constant 0 : i32
    return %c0_i32, %c0_i32_0 : i32, i32
  }
  func.func @transform_4(%arg0: i32) -> (i32, i32) {
    %c0_i32 = arith.constant 0 : i32
    %c0_i32_0 = arith.constant 0 : i32
    %c0_i32_1 = arith.constant 0 : i32
    return %c0_i32, %c0_i32_0 : i32, i32
  }
  func.func @transform_5(%arg0: i32) -> (i32, i32) {
    %c0_i32 = arith.constant 0 : i32
    %c0_i32_0 = arith.constant 0 : i32
    %c0_i32_1 = arith.constant 0 : i32
    return %c0_i32, %c0_i32_0 : i32, i32
  }
  func.func @transform_6(%arg0: i32) -> (i32, i32) {
    %c0_i32 = arith.constant 0 : i32
    %c0_i32_0 = arith.constant 0 : i32
    %c0_i32_1 = arith.constant 0 : i32
    return %c0_i32, %c0_i32_0 : i32, i32
  }
  func.func @transform_7(%arg0: i32) -> (i32, i32) {
    %c0_i32 = arith.constant 0 : i32
    %c0_i32_0 = arith.constant 0 : i32
    %c0_i32_1 = arith.constant 0 : i32
    return %c0_i32, %c0_i32_0 : i32, i32
  }
  func.func @transform_8(%arg0: i32) -> (i32, i32) {
    %c0_i32 = arith.constant 0 : i32
    %c0_i32_0 = arith.constant 0 : i32
    return %arg0, %c0_i32 : i32, i32
  }
}

</mosaic_0001>

<bundles_post_ra>
// kernel: tpu_custom_call.1
= control target key start
LH: loop header
LB: loop body
LE: loop exit
PB: predicated region body
PF: predicated region fallthrough
CT: control target
= control target key end

     0   :  { %13 = vsyncpa [#allocation3], 0  ;;  %s1640_s0 = inlined_call_operand.vmem [shape: f32[16,256], index: 0, kind: input, shape index: {}]   ;;  %s1641_s1 = inlined_call_operand.hbm [shape: f32[16,16], index: 1, kind: input, shape index: {}]   ;;  %s1642_s2 = inlined_call_operand.vmem [shape: f32[16,4], index: 2, kind: input, shape index: {}]   ;;  %s1643_s3 = inlined_call_operand.hbm [shape: f32[8,16], index: 3, kind: input, shape index: {}]   ;;  %s1644_s4 = inlined_call_operand.hbm [shape: f32[8,16], index: 4, kind: input, shape index: {}]   ;;  %s1645_s5 = inlined_call_operand.hbm [shape: f32[16,36], index: 5, kind: input, shape index: {}]   ;;  %s1646_s6 = inlined_call_operand.vmem [shape: f32[16,4], index: 6, kind: input, shape index: {}]   ;;  %s1647_s7 = inlined_call_operand.vmem [shape: f32[9,256], index: 7, kind: input, shape index: {}]   ;;  %s1648_s8 = inlined_call_operand.hbm [shape: f32[16,256], index: 8, kind: output, shape index: {}]  }
   0x1   :  { %14 = vsyncpa [#allocation6], 0 }
   0x2   :  { %15 = vsyncpa [#allocation9], 0 }
   0x3   :  { %16 = vsyncpa [#allocation4], 0  ;;  %s1295_s27 = smov [#allocation5]   ;;  %s1296_s29 = smov [#allocation2]  }
   0x4   :  { %s39_s28 = sshll.u32 %s1295_s27, 4  ;;  %s24_s30 = sshll.u32 %s1296_s29, 4  ;;  %s40_s28 = int_to_ptr.vmem [resolvable:$true] %s39_s28  ;;  %s1361_s30 = int_to_ptr.vmem [resolvable:$true] %s24_s30 }
   0x5   :  { %s1177_s11 = scalar_lea.hbm %s1643_s3, 128 }
   0x6   :  { %p1178_p0 = scmp.ne.s32.totalorder %s1643_s3, %s1177_s11  ;;  %p1181_p1 = scmp.lt.u32.totalorder %s1177_s11, %s1643_s3 }
   0x8   :  { %p1183_p2 = pnand %p1181_p1, %p1178_p0 }
   0xa   :  { %1186 = shalt.err (!%p1183_p2)
}
   0xb   :  { %s1187_s16 = scalar_lea.vmem %s40_s28, 128  ;;  %p1192_p4 = scmp.lt.s32.totalorder %s40_s28, %s40_s28 }
   0xc   :  { %p1188_p3 = scmp.ne.s32.totalorder %s40_s28, %s1187_s16  ;;  %p1193_p5 = scmp.lt.s32.totalorder %s1187_s16, %s1187_s16 }
   0xe   :  { %p1194_p6 = por %p1193_p5, %p1192_p4 }
  0x10   :  { %p1195_p7 = pnand %p1194_p6, %p1188_p3 }
  0x12   :  { %1198 = shalt.err (!%p1195_p7)
}
  0x13   :  { %42 = dma.hbm_to_vmem [thread:$0]  %s1643_s3, 128, %s40_s28, [#allocation6]  }
  0x14   :  { %s1199_s21 = scalar_lea.hbm %s1641_s1, 256 }
  0x15   :  { %p1200_p8 = scmp.ne.s32.totalorder %s1641_s1, %s1199_s21  ;;  %p1203_p9 = scmp.lt.u32.totalorder %s1199_s21, %s1641_s1 }
  0x17   :  { %p1205_p10 = pnand %p1203_p9, %p1200_p8 }
  0x19   :  { %1208 = shalt.err (!%p1205_p10)
}
  0x1a   :  { %s1209_s26 = scalar_lea.vmem %s1361_s30, 256  ;;  %p1214_p12 = scmp.lt.s32.totalorder %s1361_s30, %s1361_s30 }
  0x1b   :  { %p1210_p11 = scmp.ne.s32.totalorder %s1361_s30, %s1209_s26  ;;  %p1215_p13 = scmp.lt.s32.totalorder %s1209_s26, %s1209_s26 }
  0x1d   :  { %p1216_p0 = por %p1215_p13, %p1214_p12 }
  0x1f   :  { %p1217_p1 = pnand %p1216_p0, %p1210_p11 }
  0x21   :  { %1220 = shalt.err (!%p1217_p1)
}
  0x22   :  { %s1297_s3 = smov 128   ;;  %s1298_s27 = smov 8  }
  0x23   :  { %30 = dma.hbm_to_vmem [thread:$0]  %s1641_s1, 256, %s1361_s30, [#allocation3], %s1297_s3, %s1297_s3, %s1298_s27  }
  0x24   :  { %s1299_s9 = smov [#allocation7]   ;;  %s1300_s11 = smov [#allocation8]  }
  0x25   :  { %s49_s10 = sshll.u32 %s1299_s9, 4  ;;  %s58_s12 = sshll.u32 %s1300_s11, 4  ;;  %s50_s10 = int_to_ptr.vmem [resolvable:$true] %s49_s10  ;;  %s1395_s12 = int_to_ptr.vmem [resolvable:$true] %s58_s12 }
  0x26   :  { %s1221_s15 = scalar_lea.hbm %s1644_s4, 128 }
  0x27   :  { %p1222_p2 = scmp.ne.s32.totalorder %s1644_s4, %s1221_s15  ;;  %p1225_p3 = scmp.lt.u32.totalorder %s1221_s15, %s1644_s4 }
  0x29   :  { %p1227_p4 = pnand %p1225_p3, %p1222_p2 }
  0x2b   :  { %1230 = shalt.err (!%p1227_p4)
}
  0x2c   :  { %s1231_s1 = scalar_lea.vmem %s50_s10, 128  ;;  %p1236_p6 = scmp.lt.s32.totalorder %s50_s10, %s50_s10 }
  0x2d   :  { %p1232_p5 = scmp.ne.s32.totalorder %s50_s10, %s1231_s1  ;;  %p1237_p7 = scmp.lt.s32.totalorder %s1231_s1, %s1231_s1 }
  0x2f   :  { %p1238_p8 = por %p1237_p7, %p1236_p6 }
  0x31   :  { %p1239_p9 = pnand %p1238_p8, %p1232_p5 }
  0x33   :  { %1242 = shalt.err (!%p1239_p9)
}
  0x34   :  { %52 = dma.hbm_to_vmem [thread:$0]  %s1644_s4, 128, %s50_s10, [#allocation6]  }
  0x35   :  { %s1243_s23 = scalar_lea.hbm %s1645_s5, 256 }
  0x36   :  { %p1244_p10 = scmp.ne.s32.totalorder %s1645_s5, %s1243_s23  ;;  %p1247_p11 = scmp.lt.u32.totalorder %s1243_s23, %s1645_s5 }
  0x38   :  { %p1249_p12 = pnand %p1247_p11, %p1244_p10 }
  0x3a   :  { %1252 = shalt.err (!%p1249_p12)
}
  0x3b   :  { %s1253_s29 = scalar_lea.vmem %s1395_s12, 256  ;;  %p1258_p0 = scmp.lt.s32.totalorder %s1395_s12, %s1395_s12 }
  0x3c   :  { %p1254_p13 = scmp.ne.s32.totalorder %s1395_s12, %s1253_s29  ;;  %p1259_p1 = scmp.lt.s32.totalorder %s1253_s29, %s1253_s29 }
  0x3e   :  { %p1260_p2 = por %p1259_p1, %p1258_p0 }
  0x40   :  { %p1261_p3 = pnand %p1260_p2, %p1254_p13 }
  0x42   :  { %1264 = shalt.err (!%p1261_p3)
}
  0x43   :  { %64 = dma.hbm_to_vmem [thread:$0]  %s1645_s5, 256, %s1395_s12, [#allocation9], %s1297_s3, %s1297_s3, %s1298_s27  }
  0x44   :  { %1287 = dma.done.wait [#allocation3], 256  }
  0x45   :  { %1288 = vsyncadd [#allocation3], 4294967040 }
  0x46   :  { %1289 = dma.done.wait [#allocation6], 256  }
  0x47   :  { %1290 = vsyncadd [#allocation6], 4294967040 }
  0x48   :  { %1291 = dma.done.wait [#allocation9], 256  }
  0x49   :  { %1292 = vsyncadd [#allocation9], 4294967040  ;;  %v1432_v0 = vld [vmem:[%s1640_s0] sm:$0xff]  ;;  %v1437_v1 = vld [vmem:[%s1640_s0 + $0x8] sm:$0xff]  ;;  %vm98_vm0 = vcmask 130048   ;;  %v1301_v13 = vmov 0  }
  0x4a   :  { %v1442_v2 = vld [vmem:[%s1640_s0 + $0x10] sm:$0xff]  ;;  %v89_v3 = vadd.f32 %v1437_v1, %v1432_v0  ;;  %v1449_v4 = vld [vmem:[%s1640_s0 + $0x18] sm:$0xff]  ;;  %v85_v6 = vld [vmem:[#allocation2] sm:$0xff]  ;;  %1136 = vset.pattern.permute.xlu1 %v1301_v13  ;;  %1137 = vset.pattern.permute.xlu0 %v1301_v13  ;;  %v1302_v34 = vmov 1   ;;  %v1303_v42 = vmov 3   ;;  %v1304_v43 = vmov 0.0  }
  0x4b   :  { %v92_v5 = vadd.f32 %v1449_v4, %v1442_v2  ;;  %1079 = vmatprep.mubr.msk.f32.mxu0 %vm98_vm0, %v85_v6  ;;  %1086 = vmatprep.mubr.msk.f32.mxu1 %vm98_vm0, %v85_v6  ;;  %v86_v12 = vld [vmem:[#allocation2 + $0x8] sm:$0xff]  ;;  %v1466_v33 = vld [vmem:[%s1642_s2] sm:$0xff]  ;;  %s1306_s18 = smov 16   ;;  %vm728_vm5 = vcmask 1043456   ;;  %s1307_s19 = smov 112   ;;  %vm841_vm6 = vcmask 31744  }
  0x4c   :  { %90 = vadd.xlane.f32.xlu0 %v89_v3  ;;  %v1473_v35 = vld [vmem:[%s1642_s2 + $0x8] sm:$0xff]  ;;  %s1305_s2 = smov 127   ;;  %s1308_s1 = smov 1   ;;  %vm599_vm7 = vcmask 7168   ;;  %vm628_vm8 = vcmask 1039360   ;;  %vm540_vm9 = vcmask 138240  }
  0x4d   :  { %s1309_s30 = smov 17   ;;  %s1310_s20 = smov 15   ;;  %vm668_vm10 = vcmask 916480   ;;  %vm579_vm11 = vcmask 121856   ;;  %vm648_vm12 = vcmask 924672   ;;  %vm688_vm13 = vcmask 908288  }
  0x4e   :  { %s1311_s21 = smov 113   ;;  %s1312_s24 = smov 111   ;;  %vm747_vm14 = vcmask 293888   ;;  %vm947_vm15 = vcmask 15360  }
  0x50   :  { %93 = vadd.xlane.f32.xlu0 %v92_v5 }
  0xd9   :  { %v91_v7 = vpop.xlane.xlu0 %90 }
  0xda   :  { %v96_v9 = vmul.f32 0.00390625, %v91_v7 }
  0xdd   :  { %v94_v8 = vpop.xlane.xlu0 %93 }
  0xde   :  { %v97_v10 = vmul.f32 0.00390625, %v94_v8 }
  0xe0   :  { %v1089_v11 = vpack.c.bf16 %v97_v10, %v96_v9 }
  0xe2   :  { %1090 = vmatprep.subr.bf16.mxu0 %v1089_v11 }
  0xe3   :  { %1092 = vmatpush3.bf16.msra.mxu0 %v1089_v11 }
  0xe6   :  { %1080 = vmatmul.mubr.msk.f32.vlgmr.msra.gmra.mrb[0].mxu0 %vm98_vm0, %v86_v12 }
  0xe7   :  { %448 = vmatprep.mubr.f32.mxu0 %v1304_v43 }
 0x1b9   :  { %v1081_v14 = vpop.f32.mrb[0].mxu0 }
 0x1ba   :  { %v171_v15 = vpop.f32.mrb[1].mxu0 }
 0x1bb   :  { %182 = vperm.xlu1 %1136, %v171_v15  }
 0x1bf   :  { %187 = vperm.xlu1 %1136, %v1081_v14  }
 0x1c3   :  { %1138 = vset.pattern.permute.xlu1 %v1302_v34 }
 0x23a   :  { %v183_v16 = vpop.permute.xlu1 %182 }
 0x23b   :  { %v190_v17 = vsub.f32 %v1432_v0, %v183_v16  ;;  %v191_v18 = vsub.f32 %v1437_v1, %v183_v16 }
 0x23d   :  { %v194_v19 = vmul.f32 %v190_v17, %v190_v17  ;;  %v195_v20 = vmul.f32 %v191_v18, %v191_v18 }
 0x23e   :  { %v188_v21 = vpop.permute.xlu1 %187 }
 0x23f   :  { %v192_v22 = vsub.f32 %v1442_v2, %v188_v21  ;;  %v193_v23 = vsub.f32 %v1449_v4, %v188_v21  ;;  %v198_v24 = vadd.f32 %v195_v20, %v194_v19 }
 0x241   :  { %199 = vadd.xlane.f32.xlu0 %v198_v24  ;;  %v196_v25 = vmul.f32 %v192_v22, %v192_v22  ;;  %v197_v26 = vmul.f32 %v193_v23, %v193_v23 }
 0x243   :  { %v201_v27 = vadd.f32 %v197_v26, %v196_v25 }
 0x245   :  { %202 = vadd.xlane.f32.xlu1 %v201_v27 }
 0x256   :  { %312 = vperm.xlu1 %1138, %v1466_v33  }
 0x257   :  { %299 = vperm.xlu0 %1137, %v1466_v33  }
 0x25a   :  { %1139 = vset.pattern.permute.xlu1 %v1301_v13 }
 0x25b   :  { %304 = vperm.xlu0 %1137, %v1473_v35  }
 0x2ce   :  { %v200_v28 = vpop.xlane.xlu0 %199 }
 0x2cf   :  { %v204_v30 = vmul.f32 0.00390625, %v200_v28 }
 0x2d2   :  { %v203_v29 = vpop.xlane.xlu1 %202 }
 0x2d3   :  { %v205_v31 = vmul.f32 0.00390625, %v203_v29 }
 0x2d5   :  { %v1093_v32 = vpack.c.bf16 %v205_v31, %v204_v30 }
 0x2d6   :  { %v300_v44 = vpop.permute.xlu0 %299  ;;  %v313_v45 = vpop.permute.xlu1 %312 }
 0x2d7   :  { %1094 = vmatprep.subr.bf16.mxu1 %v1093_v32 }
 0x2d8   :  { %1096 = vmatpush3.bf16.msra.mxu1 %v1093_v32 }
 0x2da   :  { %v305_v46 = vpop.permute.xlu0 %304 }
 0x2db   :  { %1087 = vmatmul.mubr.msk.f32.vlgmr.msra.gmra.mrb[0].mxu1 %vm98_vm0, %v86_v12 }
 0x2dc   :  { %824 = vmatprep.mubr.f32.mxu1 %v1304_v43 }
 0x3ae   :  { %v1088_v36 = vpop.f32.mrb[0].mxu1 }
 0x3af   :  { %v278_v37 = vadd.f32 1e-05, %v1088_v36  ;;  %v272_v38 = vpop.f32.mrb[1].mxu1 }
 0x3b0   :  { %v273_v39 = vadd.f32 1e-05, %v272_v38 }
 0x3b1   :  { %1149 = vrsqrt.f32 %v278_v37 }
 0x3b2   :  { %1151 = vrsqrt.f32 %v273_v39 }
 0x3bb   :  { %v1150_v40 = vpop.eup %1149 }
 0x3bc   :  { %v1152_v41 = vpop.eup %1151  ;;  %290 = vperm.xlu1 %1139, %v1150_v40  }
 0x3bd   :  { %285 = vperm.xlu0 %1137, %v1152_v41  }
 0x3c0   :  { %1141 = vset.pattern.permute.xlu1 %v1303_v42 }
 0x3c1   :  { %324 = vperm.xlu1 %1141, %v1466_v33   ;;  %1140 = vset.pattern.permute.xlu0 %v1302_v34 }
 0x3c2   :  { %316 = vperm.xlu0 %1140, %v1473_v35  }
 0x3c5   :  { %328 = vperm.xlu1 %1141, %v1473_v35  }
 0x43b   :  { %v291_v47 = vpop.permute.xlu1 %290 }
 0x43c   :  { %v295_v48 = vmul.f32 %v291_v47, %v192_v22  ;;  %v296_v49 = vmul.f32 %v291_v47, %v193_v23  ;;  %v286_v50 = vpop.permute.xlu0 %285  ;;  %v380_v47 = vld [vmem:[#allocation7] sm:$0xff] }
 0x43d   :  { %v293_v51 = vmul.f32 %v286_v50, %v190_v17  ;;  %v294_v52 = vmul.f32 %v286_v50, %v191_v18 }
 0x43e   :  { %v309_v56 = vmul.f32 %v305_v46, %v295_v48  ;;  %v310_v57 = vmul.f32 %v305_v46, %v296_v49 }
 0x43f   :  { %v307_v53 = vmul.f32 %v300_v44, %v293_v51  ;;  %v308_v54 = vmul.f32 %v300_v44, %v294_v52  ;;  %v837_v51 = vld [vmem:[%s1646_s6] sm:$0xff]  ;;  %v838_v52 = vld [vmem:[%s1646_s6 + $0x8] sm:$0xff] }
 0x440   :  { %v325_v55 = vpop.permute.xlu1 %324 }
 0x441   :  { %v319_v58 = vadd.f32 %v313_v45, %v307_v53  ;;  %v320_v59 = vadd.f32 %v313_v45, %v308_v54  ;;  %v317_v60 = vpop.permute.xlu0 %316  ;;  %v1313_v53 = vmov 2   ;;  %v545_v54 = vlaneseq }
 0x442   :  { %v321_v61 = vadd.f32 %v317_v60, %v309_v56  ;;  %v322_v62 = vadd.f32 %v317_v60, %v310_v57  ;;  %1142 = vset.pattern.permute.xlu0 %v1313_v53  ;;  %1143 = vset.pattern.permute.xlu1 %v1313_v53 }
 0x443   :  { %v331_v63 = vmul.f32 %v325_v55, %v319_v58  ;;  %v332_v3 = vmul.f32 %v325_v55, %v320_v59  ;;  %v546_v55 = vshrl.u32 %v545_v54, 7 }
 0x444   :  { %v329_v5 = vpop.permute.xlu1 %328 }
 0x445   :  { %v1051_v6 = vmul.f32 -1.442695, %v331_v63  ;;  %v1052_v7 = vmul.f32 -1.442695, %v332_v3  ;;  %v333_v8 = vmul.f32 %v329_v5, %v321_v61  ;;  %v334_v9 = vmul.f32 %v329_v5, %v322_v62  ;;  %v529_v61 = vld [vmem:[%s1647_s7] sm:$0xff] }
 0x446   :  { %v616_v58 = vsub.s32 4, %v546_v55  ;;  %v606_v62 = vsub.s32 3, %v546_v55 }
 0x447   :  { %1153 = vpow2.f32 %v1051_v6  ;;  %v1053_v10 = vmul.f32 -1.442695, %v333_v8  ;;  %v1054_v11 = vmul.f32 -1.442695, %v334_v9  ;;  %v636_v6 = vsub.s32 5, %v546_v55 }
 0x448   :  { %1155 = vpow2.f32 %v1052_v7  ;;  %v617_v63 = vrot.slane %v529_v61, %v616_v58  ;;  %v547_v8 = vsub.s32 0, %v546_v55 }
 0x449   :  { %1157 = vpow2.f32 %v1053_v10 }
 0x44a   :  { %1159 = vpow2.f32 %v1054_v11  ;;  %v676_v11 = vsub.s32 7, %v546_v55 }
 0x451   :  { %v1154_v12 = vpop.eup %1153 }
 0x452   :  { %v1156_v14 = vpop.eup %1155  ;;  %v347_v15 = vadd.f32 1.0, %v1154_v12  ;;  %v607_v12 = vrot.slane %v529_v61, %v606_v62 }
 0x453   :  { %v1158_v16 = vpop.eup %1157  ;;  %v348_v17 = vadd.f32 1.0, %v1156_v14 }
 0x454   :  { %v1160_v18 = vpop.eup %1159  ;;  %1161 = vrcp.f32 %v347_v15  ;;  %v349_v19 = vadd.f32 1.0, %v1158_v16  ;;  %v586_v16 = vsub.s32 2, %v546_v55 }
 0x455   :  { %1163 = vrcp.f32 %v348_v17  ;;  %v350_v20 = vadd.f32 1.0, %v1160_v18 }
 0x456   :  { %1165 = vrcp.f32 %v349_v19  ;;  %v637_v19 = vrot.slane %v529_v61, %v636_v6 }
 0x457   :  { %1167 = vrcp.f32 %v350_v20 }
 0x45e   :  { %v1162_v21 = vpop.eup %1161 }
 0x45f   :  { %v1164_v22 = vpop.eup %1163  ;;  %vm359_vm1 = vcmp.gt.f32.partialorder %v1162_v21, 0.5 }
 0x460   :  { %v1166_v23 = vpop.eup %1165  ;;  %vm360_vm2 = vcmp.gt.f32.partialorder %v1164_v22, 0.5  ;;  %v367_v24 = vsel %vm359_vm1, 0.0, %v1162_v21  ;;  %v363_v44 = vsel %vm359_vm1, 1.0, %v1162_v21 }
 0x461   :  { %v1168_v25 = vpop.eup %1167  ;;  %v368_v26 = vsel %vm360_vm2, 0.0, %v1164_v22  ;;  %vm361_vm3 = vcmp.gt.f32.partialorder %v1166_v23, 0.5  ;;  %v375_v28 = vmul.f32 %v367_v24, %v1432_v0  ;;  %v364_v31 = vsel %vm360_vm2, 1.0, %v1164_v22 }
 0x462   :  { %vm362_vm4 = vcmp.gt.f32.partialorder %v1168_v25, 0.5  ;;  %v369_v27 = vsel %vm361_vm3, 0.0, %v1166_v23  ;;  %v376_v36 = vmul.f32 %v368_v26, %v1437_v1  ;;  %v365_v39 = vsel %vm361_vm3, 1.0, %v1166_v23 }
 0x463   :  { %v370_v29 = vsel %vm362_vm4, 0.0, %v1168_v25  ;;  %v377_v30 = vmul.f32 %v369_v27, %v1442_v2  ;;  %v366_v32 = vsel %vm362_vm4, 1.0, %v1168_v25  ;;  %v372_v42 = vmul.f32 %v364_v31, %v1437_v1 }
 0x464   :  { %v378_v37 = vmul.f32 %v370_v29, %v1449_v4  ;;  %v374_v38 = vmul.f32 %v366_v32, %v1449_v4  ;;  %v373_v45 = vmul.f32 %v365_v39, %v1442_v2  ;;  %v371_v48 = vmul.f32 %v363_v44, %v1432_v0  ;;  %v379_v4 = vld [vmem:[#allocation5] sm:$0xff] }
 0x465   :  { %v1099_v40 = vpack.c.bf16 %v377_v30, %v375_v28  ;;  %v548_v24 = vrot.slane %v529_v61, %v547_v8  ;;  %v677_v26 = vrot.slane %v529_v61, %v676_v11  ;;  %v656_v27 = vsub.s32 6, %v546_v55 }
 0x466   :  { %v1097_v41 = vpack.c.bf16 %v378_v37, %v376_v36  ;;  %v1101_v46 = vpack.c.bf16 %v374_v38, %v372_v42  ;;  %v1103_v49 = vpack.c.bf16 %v373_v45, %v371_v48  ;;  %v587_v30 = vrot.slane %v529_v61, %v586_v16 }
 0x468   :  { %1098 = vmatprep.subr.bf16.mxu0 %v1097_v41 }
 0x469   :  { %1100 = vmatpush1.bf16.msra.mxu0 %v1099_v40 }
 0x46a   :  { %1102 = vmatprep.subr.bf16.mxu0 %v1101_v46  ;;  %v657_v46 = vrot.slane %v529_v61, %v656_v27 }
 0x46c   :  { %1055 = vmatmul.mubr.msk.f32.vlgmr.msra.gmra.mrb[2].mxu0 %vm98_vm0, %v380_v47 }
 0x46d   :  { %1104 = vmatpush1.bf16.msra.mxu0 %v1103_v49  ;;  %522 = vmatprep.mubr.f32.mxu0 %v1304_v43 }
 0x474   :  { %1056 = vmatmul.mubr.msk.f32.vlgmr.msra.gmra.mrb[2].mxu0 %vm98_vm0, %v379_v4 }
 0x475   :  { %916 = vmatprep.mubr.f32.mxu0 %v1304_v43 }
 0x547   :  { %v1498_v1 = vpop.f32.mrb[2].mxu0 }
 0x548   :  { %624 = vrot.lane.b32.xlu0 %v1498_v1, %s1305_s2  ;;  %558 = vrot.lane.b32.xlu1 %v1498_v1, %s1306_s18  ;;  %v1503_v0 = vpop.f32.mrb[3].mxu0  ;;  %v839_v50 = vrot.slane %v1498_v1, 4  ;;  %v1544_v15 = vmul.f32 %v617_v63, %v1498_v1 }
 0x549   :  { %v840_v2 = vrot.slane %v1503_v0, 4 }
 0x54b   :  { %1063 = vmatprep.subr.msk.mxu0 %vm728_vm5, %v840_v2 }
 0x54c   :  { %664 = vrot.lane.b32.xlu0 %v1498_v1, %s1307_s19  ;;  %597 = vrot.lane.b32.xlu1 %v1498_v1, %s1308_s1 }
 0x54d   :  { %1064 = vmatpush1.msk.msra.mxu0 %vm728_vm5, %v839_v50 }
 0x54e   :  { %1065 = vmatmul.mubr.msk.f32.vlgmr.msra.gmra.mrb[4].mxu0 %vm841_vm6, %v837_v51 }
 0x54f   :  { %922 = vmatprep.mubr.f32.mxu0 %v1304_v43 }
 0x550   :  { %538 = vrot.lane.b32.xlu1 %v1498_v1, %s1309_s30  ;;  %555 = vrot.lane.b32.xlu0 %v1503_v0, %s1306_s18 }
 0x552   :  { %1066 = vmatmul.mubr.msk.f32.gmra.mrb[6].mxu0 %vm841_vm6, %v838_v52 }
 0x554   :  { %577 = vrot.lane.b32.xlu1 %v1498_v1, %s1310_s20  ;;  %594 = vrot.lane.b32.xlu0 %v1503_v0, %s1308_s1 }
 0x558   :  { %626 = vrot.lane.b32.xlu1 %v1503_v0, %s1305_s2  ;;  %534 = vrot.lane.b32.xlu0 %v1503_v0, %s1309_s30 }
 0x55c   :  { %666 = vrot.lane.b32.xlu1 %v1503_v0, %s1307_s19  ;;  %574 = vrot.lane.b32.xlu0 %v1503_v0, %s1310_s20 }
 0x560   :  { %646 = vrot.lane.b32.xlu1 %v1503_v0, %s1311_s21  ;;  %644 = vrot.lane.b32.xlu0 %v1498_v1, %s1311_s21 }
 0x564   :  { %686 = vrot.lane.b32.xlu1 %v1503_v0, %s1312_s24  ;;  %684 = vrot.lane.b32.xlu0 %v1498_v1, %s1312_s24 }
 0x568   :  { %740 = vperm.xlu0 %1142, %v1466_v33   ;;  %744 = vperm.xlu1 %1143, %v1473_v35   ;;  %v530_v33 = vld [vmem:[%s1647_s7 + $0x8] sm:$0xff]  ;;  %v566_v35 = vsub.s32 1, %v546_v55 }
 0x569   :  { %v621_v7 = vrot.slane %v530_v33, %v616_v58  ;;  %v611_v14 = vrot.slane %v530_v33, %v606_v62  ;;  %v641_v20 = vrot.slane %v530_v33, %v636_v6  ;;  %v552_v25 = vrot.slane %v530_v33, %v547_v8 }
 0x56a   :  { %v567_v9 = vrot.slane %v529_v61, %v566_v35  ;;  %v571_v10 = vrot.slane %v530_v33, %v566_v35  ;;  %v681_v29 = vrot.slane %v530_v33, %v676_v11  ;;  %v591_v39 = vrot.slane %v530_v33, %v586_v16 }
 0x56b   :  { %v1547_v21 = vmul.f32 %v621_v7, %v1503_v0  ;;  %v661_v47 = vrot.slane %v530_v33, %v656_v27 }
 0x56c   :  { %1145 = vset.pattern.permute.xlu1 %v1302_v34  ;;  %1144 = vset.pattern.permute.xlu0 %v1301_v13 }
 0x5ba   :  { %v625_v56 = vpop.permute.xlu0 %624  ;;  %v559_v57 = vpop.permute.xlu1 %558 }
 0x5be   :  { %v1535_v59 = vpop.permute.xlu0 %664  ;;  %v598_v60 = vpop.permute.xlu1 %597 }
 0x5c2   :  { %v539_v3 = vpop.permute.xlu1 %538  ;;  %v556_v5 = vpop.permute.xlu0 %555 }
 0x5c3   :  { %v560_v22 = vsel %vm98_vm0, %v559_v57, %v556_v5  ;;  %v563_v23 = vsel %vm98_vm0, %v556_v5, %v559_v57 }
 0x5c4   :  { %v572_v31 = vmul.f32 %v567_v9, %v563_v23  ;;  %v573_v32 = vmul.f32 %v571_v10, %v560_v22 }
 0x5c6   :  { %v578_v17 = vpop.permute.xlu1 %577  ;;  %v595_v18 = vpop.permute.xlu0 %594  ;;  %v706_v1 = vrot.slane %v572_v31, 4  ;;  %v707_v0 = vrot.slane %v573_v32, 4 }
 0x5c7   :  { %v603_v28 = vsel %vm599_vm7, %v595_v18, %v598_v60  ;;  %v600_v36 = vsel %vm599_vm7, %v598_v60, %v595_v18 }
 0x5c8   :  { %v612_v45 = vmul.f32 %v607_v12, %v603_v28  ;;  %v613_v48 = vmul.f32 %v611_v14, %v600_v36  ;;  %v738_v36 = vld [vmem:[#allocation8 + $0x8] sm:$0xff] }
 0x5ca   :  { %v627_v37 = vpop.permute.xlu1 %626  ;;  %v535_v38 = vpop.permute.xlu0 %534  ;;  %v712_v57 = vrot.slane %v612_v45, 4  ;;  %v713_v33 = vrot.slane %v613_v48, 4 }
 0x5cb   :  { %v629_v40 = vsel %vm628_vm8, %v625_v56, %v627_v37  ;;  %v633_v41 = vsel %vm628_vm8, %v627_v37, %v625_v56  ;;  %v541_v42 = vsel %vm540_vm9, %v539_v3, %v535_v38  ;;  %v544_v44 = vsel %vm540_vm9, %v535_v38, %v539_v3 }
 0x5cc   :  { %v642_v49 = vmul.f32 %v637_v19, %v629_v40  ;;  %v643_v4 = vmul.f32 %v641_v20, %v633_v41  ;;  %v553_v2 = vmul.f32 %v548_v24, %v544_v44  ;;  %v554_v50 = vmul.f32 %v552_v25, %v541_v42  ;;  %v1058_v19 = vld [vmem:[%s1647_s7 + $0x18] ss:$0 sm:$0xff] }
 0x5ce   :  { %v667_v51 = vpop.permute.xlu1 %666  ;;  %v575_v52 = vpop.permute.xlu0 %574  ;;  %v718_v35 = vrot.slane %v642_v49, 4  ;;  %v719_v62 = vrot.slane %v643_v4, 4  ;;  %v729_v3 = vsel %vm728_vm5, %v553_v2, %v706_v1 }
 0x5cf   :  { %v669_v53 = vsel %vm668_vm10, %v1535_v59, %v667_v51  ;;  %v673_v54 = vsel %vm668_vm10, %v667_v51, %v1535_v59  ;;  %v580_v55 = vsel %vm579_vm11, %v578_v17, %v575_v52  ;;  %v583_v56 = vsel %vm579_vm11, %v575_v52, %v578_v17 }
 0x5d0   :  { %v682_v58 = vmul.f32 %v677_v26, %v669_v53  ;;  %v683_v60 = vmul.f32 %v681_v29, %v673_v54  ;;  %v592_v61 = vmul.f32 %v587_v30, %v583_v56  ;;  %v593_v63 = vmul.f32 %v591_v39, %v580_v55 }
 0x5d1   :  { %v730_v59 = vsel %vm728_vm5, %v554_v50, %v707_v0  ;;  %v733_v20 = vsel %vm728_vm5, %v1544_v15, %v718_v35  ;;  %v734_v25 = vsel %vm728_vm5, %v1547_v21, %v719_v62  ;;  %v1057_v15 = vld [vmem:[%s1647_s7 + $0x10] ss:$0 sm:$0xff]  ;;  %v737_v21 = vld [vmem:[#allocation8] sm:$0xff]  ;;  %s1314_s7 = smov [#allocation10]  }
 0x5d2   :  { %v724_v5 = vrot.slane %v682_v58, 4  ;;  %v731_v6 = vsel %vm728_vm5, %v592_v61, %v712_v57  ;;  %v647_v7 = vpop.permute.xlu1 %646  ;;  %v645_v8 = vpop.permute.xlu0 %644  ;;  %v732_v11 = vsel %vm728_vm5, %v593_v63, %v713_v33  ;;  %v725_v14 = vrot.slane %v683_v60, 4  ;;  %s1033_s14 = sshll.u32 %s1314_s7, 4  ;;  %s1034_s14 = int_to_ptr.vmem [resolvable:$true] %s1033_s14 }
 0x5d3   :  { %v649_v9 = vsel %vm648_vm12, %v645_v8, %v647_v7  ;;  %v653_v10 = vsel %vm648_vm12, %v647_v7, %v645_v8  ;;  %v1107_v12 = vpack.c.bf16 %v731_v6, %v729_v3  ;;  %v1105_v18 = vpack.c.bf16 %v732_v11, %v730_v59  ;;  %s1265_s15 = scalar_lea.vmem %s1034_s14, 512  ;;  %p1270_p5 = scmp.lt.s32.totalorder %s1034_s14, %s1034_s14 }
 0x5d4   :  { %v662_v16 = vmul.f32 %v657_v46, %v649_v9  ;;  %v663_v17 = vmul.f32 %v661_v47, %v653_v10  ;;  %p1266_p4 = scmp.ne.s32.totalorder %s1034_s14, %s1265_s15  ;;  %p1271_p6 = scmp.lt.s32.totalorder %s1265_s15, %s1265_s15 }
 0x5d5   :  { %1106 = vmatprep.subr.bf16.mxu1 %v1105_v18 }
 0x5d6   :  { %v735_v22 = vsel %vm728_vm5, %v662_v16, %v724_v5  ;;  %v687_v23 = vpop.permute.xlu1 %686  ;;  %v685_v24 = vpop.permute.xlu0 %684  ;;  %v736_v26 = vsel %vm728_vm5, %v663_v17, %v725_v14  ;;  %1108 = vmatpush1.bf16.msra.mxu1 %v1107_v12  ;;  %p1272_p7 = por %p1271_p6, %p1270_p5 }
 0x5d7   :  { %v693_v27 = vsel %vm688_vm13, %v687_v23, %v685_v24  ;;  %v1109_v28 = vpack.c.bf16 %v736_v26, %v734_v25  ;;  %v1111_v29 = vpack.c.bf16 %v735_v22, %v733_v20  ;;  %v689_v31 = vsel %vm688_vm13, %v685_v24, %v687_v23 }
 0x5d8   :  { %v703_v30 = vmul.f32 %v1058_v19, %v693_v27  ;;  %v702_v32 = vmul.f32 %v1057_v15, %v689_v31  ;;  %p1273_p8 = pnand %p1272_p7, %p1266_p4 }
 0x5d9   :  { %1110 = vmatprep.subr.bf16.mxu1 %v1109_v28 }
 0x5da   :  { %1112 = vmatpush1.bf16.msra.mxu1 %v1111_v29 }
 0x5db   :  { %1059 = vmatprep.subr.msk.mxu1 %vm728_vm5, %v703_v30 }
 0x5de   :  { %1060 = vmatpush1.msk.msra.mxu1 %vm728_vm5, %v702_v32 }
 0x5df   :  { %1061 = vmatmul.mubr.msk.f32.vlgmr.msra.gmra.mrb[2].mxu1 %vm747_vm14, %v737_v21 }
 0x5e0   :  { %830 = vmatprep.mubr.f32.mxu1 %v1304_v43 }
 0x5e3   :  { %1062 = vmatmul.mubr.msk.f32.gmra.mrb[4].mxu1 %vm747_vm14, %v738_v36 }
 0x5e7   :  { %v741_v44 = vpop.permute.xlu0 %740  ;;  %v745_v48 = vpop.permute.xlu1 %744 }
 0x621   :  { %v1586_v37 = vpop.f32.mrb[4].mxu0 }
 0x622   :  { %v1588_v38 = vpop.f32.mrb[5].mxu0 }
 0x623   :  { %v937_v42 = vadd.f32 %v1588_v38, %v1586_v37 }
 0x625   :  { %v1590_v39 = vpop.f32.mrb[6].mxu0 }
 0x626   :  { %v1592_v40 = vpop.f32.mrb[7].mxu0 }
 0x627   :  { %v940_v41 = vadd.f32 %v1592_v40, %v1590_v39 }
 0x6b2   :  { %v826_v45 = vpop.f32.mrb[2].mxu1 }
 0x6b3   :  { %v1598_v46 = vadd.f32 %v826_v45, %v741_v44  ;;  %v828_v43 = vpop.f32.mrb[3].mxu1 }
 0x6b4   :  { %v1600_v47 = vadd.f32 %v828_v43, %v741_v44 }
 0x6b6   :  { %v832_v49 = vpop.f32.mrb[4].mxu1  ;;  %v929_v4 = vadd.f32 %v1600_v47, %v1598_v46 }
 0x6b7   :  { %v1604_v1 = vadd.f32 %v832_v49, %v745_v48  ;;  %v834_v0 = vpop.f32.mrb[5].mxu1 }
 0x6b8   :  { %v1606_v2 = vadd.f32 %v834_v0, %v745_v48  ;;  %930 = vadd.xlane.f32.xlu1 %v929_v4 }
 0x6ba   :  { %v932_v50 = vadd.f32 %v1606_v2, %v1604_v1 }
 0x6bc   :  { %933 = vadd.xlane.f32.xlu0 %v932_v50  ;;  %941 = vadd.xlane.f32.xlu1 %v940_v41 }
 0x6c0   :  { %938 = vadd.xlane.f32.xlu0 %v937_v42 }
 0x745   :  { %v931_v51 = vpop.xlane.xlu1 %930 }
 0x746   :  { %v935_v60 = vmul.f32 0.00390625, %v931_v51 }
 0x749   :  { %v934_v52 = vpop.xlane.xlu0 %933  ;;  %v942_v53 = vpop.xlane.xlu1 %941 }
 0x74a   :  { %v936_v54 = vmul.f32 0.00390625, %v934_v52  ;;  %v944_v55 = vmul.f32 0.00390625, %v942_v53 }
 0x74c   :  { %v946_v56 = vsel %vm599_vm7, %v936_v54, %v944_v55 }
 0x74d   :  { %v939_v57 = vpop.xlane.xlu0 %938  ;;  %v971_v58 = vsel %vm947_vm15, %v946_v56, -inf }
 0x74e   :  { %v943_v61 = vmul.f32 0.00390625, %v939_v57  ;;  %972 = vmax.xlane.f32.xlu1 %v971_v58 }
 0x750   :  { %v945_v33 = vsel %vm599_vm7, %v935_v60, %v943_v61 }
 0x751   :  { %v948_v35 = vsel %vm947_vm15, %v945_v33, -inf }
 0x752   :  { %949 = vmax.xlane.f32.xlu0 %v948_v35 }
 0x7db   :  { %v973_v62 = vpop.xlane.xlu1 %972 }
 0x7dc   :  { %v974_v63 = vrot.slane %v973_v62, 4 }
 0x7de   :  { %v975_v3 = vmax.f32 %v973_v62, %v974_v63 }
 0x7df   :  { %v950_v5 = vpop.xlane.xlu0 %949 }
 0x7e0   :  { %v976_v6 = vrot.slane %v975_v3, 2  ;;  %v951_v7 = vrot.slane %v950_v5, 4 }
 0x7e2   :  { %v977_v8 = vmax.f32 %v975_v3, %v976_v6  ;;  %v952_v59 = vmax.f32 %v950_v5, %v951_v7 }
 0x7e4   :  { %v978_v9 = vrot.slane %v977_v8, 1  ;;  %v953_v10 = vrot.slane %v952_v59, 2 }
 0x7e6   :  { %v979_v11 = vmax.f32 %v977_v8, %v978_v9  ;;  %v954_v12 = vmax.f32 %v952_v59, %v953_v10 }
 0x7e8   :  { %v980_v14 = vsub.f32 %v946_v56, %v979_v11  ;;  %v955_v16 = vrot.slane %v954_v12, 1 }
 0x7ea   :  { %v981_v17 = vmul.f32 1.442695, %v980_v14  ;;  %v956_v18 = vmax.f32 %v954_v12, %v955_v16 }
 0x7ec   :  { %1169 = vpow2.f32 %v981_v17  ;;  %v957_v19 = vsub.f32 %v945_v33, %v956_v18 }
 0x7ee   :  { %v958_v20 = vmul.f32 1.442695, %v957_v19 }
 0x7f0   :  { %1171 = vpow2.f32 %v958_v20 }
 0x7f6   :  { %v1170_v22 = vpop.eup %1169 }
 0x7f7   :  { %v983_v23 = vsel %vm947_vm15, %v1170_v22, 0.0 }
 0x7f8   :  { %984 = vadd.xlane.f32.xlu1 %v983_v23 }
 0x7fa   :  { %v1172_v24 = vpop.eup %1171 }
 0x7fb   :  { %v960_v25 = vsel %vm947_vm15, %v1172_v24, 0.0 }
 0x7fc   :  { %961 = vadd.xlane.f32.xlu0 %v960_v25 }
 0x885   :  { %v985_v26 = vpop.xlane.xlu1 %984 }
 0x886   :  { %v986_v27 = vrot.slane %v985_v26, 4 }
 0x888   :  { %v987_v28 = vadd.f32 %v986_v27, %v985_v26 }
 0x889   :  { %v962_v29 = vpop.xlane.xlu0 %961 }
 0x88a   :  { %v988_v30 = vrot.slane %v987_v28, 2  ;;  %v963_v15 = vrot.slane %v962_v29, 4 }
 0x88c   :  { %v964_v31 = vadd.f32 %v963_v15, %v962_v29  ;;  %v989_v32 = vadd.f32 %v988_v30, %v987_v28 }
 0x88e   :  { %v965_v21 = vrot.slane %v964_v31, 2  ;;  %v990_v41 = vrot.slane %v989_v32, 1 }
 0x890   :  { %v966_v36 = vadd.f32 %v965_v21, %v964_v31  ;;  %v991_v45 = vadd.f32 %v990_v41, %v989_v32 }
 0x892   :  { %v967_v42 = vrot.slane %v966_v36, 1 }
 0x894   :  { %v968_v44 = vadd.f32 %v967_v42, %v966_v36 }
 0x896   :  { %1173 = vrcp.f32 %v968_v44 }
 0x897   :  { %1175 = vrcp.f32 %v991_v45 }
 0x8a0   :  { %v1174_v43 = vpop.eup %1173 }
 0x8a1   :  { %v970_v48 = vmul.f32 %v1174_v43, %v1172_v24  ;;  %v1176_v49 = vpop.eup %1175 }
 0x8a2   :  { %v993_v4 = vmul.f32 %v1176_v49, %v1170_v22 }
 0x8a3   :  { %996 = vperm.xlu0 %1144, %v970_v48   ;;  %1009 = vperm.xlu1 %1145, %v970_v48  }
 0x8a7   :  { %1146 = vset.pattern.permute.xlu1 %v1301_v13  ;;  %1148 = vset.pattern.permute.xlu0 %v1302_v34 }
 0x8a8   :  { %1001 = vperm.xlu1 %1146, %v993_v4  }
 0x8ac   :  { %1147 = vset.pattern.permute.xlu1 %v1302_v34 }
 0x8ad   :  { %1013 = vperm.xlu1 %1147, %v993_v4  }
 0x922   :  { %v997_v0 = vpop.permute.xlu0 %996  ;;  %v1010_v50 = vpop.permute.xlu1 %1009 }
 0x923   :  { %v1004_v51 = vmul.f32 %v997_v0, %v1598_v46  ;;  %v1005_v52 = vmul.f32 %v997_v0, %v1600_v47  ;;  %v1016_v53 = vmul.f32 %v1010_v50, %v1586_v37  ;;  %v1017_v54 = vmul.f32 %v1010_v50, %v1588_v38 }
 0x925   :  { %v1020_v55 = vadd.f32 %v1016_v53, %v1004_v51  ;;  %v1021_v56 = vadd.f32 %v1017_v54, %v1005_v52 }
 0x927   :  { %1024 = vst [vmem:[#allocation10] sm:$0xff] %v1020_v55  ;;  %1025 = vst [vmem:[#allocation10 + $0x8] sm:$0xff] %v1021_v56  ;;  %v1002_v13 = vpop.permute.xlu1 %1001 }
 0x928   :  { %v1006_v34 = vmul.f32 %v1002_v13, %v1604_v1  ;;  %v1007_v58 = vmul.f32 %v1002_v13, %v1606_v2 }
 0x92c   :  { %v1014_v57 = vpop.permute.xlu1 %1013 }
 0x92d   :  { %v1018_v46 = vmul.f32 %v1014_v57, %v1590_v39  ;;  %v1019_v47 = vmul.f32 %v1014_v57, %v1592_v40 }
 0x92f   :  { %v1022_v60 = vadd.f32 %v1018_v46, %v1006_v34  ;;  %v1023_v37 = vadd.f32 %v1019_v47, %v1007_v58 }
 0x931   :  { %1026 = vst [vmem:[#allocation10 + $0x10] sm:$0xff] %v1022_v60  ;;  %1027 = vst [vmem:[#allocation10 + $0x18] sm:$0xff] %v1023_v37 }
 0x932   :  { %1276 = shalt.err (!%p1273_p8)
}
 0x933   :  { %s1277_s3 = scalar_lea.hbm %s1648_s8, 512 }
 0x934   :  { %p1278_p9 = scmp.ne.s32.totalorder %s1648_s8, %s1277_s3  ;;  %p1281_p10 = scmp.lt.u32.totalorder %s1277_s3, %s1648_s8 }
 0x936   :  { %p1283_p11 = pnand %p1281_p10, %p1278_p9 }
 0x938   :  { %1286 = shalt.err (!%p1283_p11)
}
 0x939   :  { %s1315_s2 = smov 256  }
 0x93a   :  { %1039 = dma.vmem_to_hbm [thread:$0]  %s1034_s14, 512, %s1648_s8, [#allocation4], %s1315_s2, %s1315_s2, %s1306_s18  }
 0x93b   :  { %1293 = dma.done.wait [#allocation4], 512  }
 0x93c   :  { %1294 = vsyncadd [#allocation4], 4294966784 }
 0x93d   :  { %1043 = vsyncpa [#allocation3], 1 }
 0x93e   :  { %1044 = vsyncpa [#allocation6], 1 }
 0x93f   :  { %1045 = vsyncpa [#allocation9], 1 }
 0x940   :  { %1046 = vsyncpa [#allocation4], 1 }

</bundles_post_ra>
